<compile_context>
chip_gen: v7x
topology: tpu7x:2x2x1
jax: 0.10.0
libtpu: 0.0.40
codegen_flags: <defaults>
</compile_context>

<pallas_src>
import functools

import jax
import jax.numpy as jnp
from jax import lax
from jax.experimental import pallas as pl
from jax.experimental.pallas import tpu as pltpu


def _round_up(v, m):
    return (v + m - 1) // m * m


def _build_slab(entries, width, dtype, align):
    """Pack 2-D arrays into one (rows, width) slab of `dtype`.

    Each entry starts on a row that is a multiple of `align` (8 for f32,
    16 for bf16 sublane packing); unused rows/cols are zero.
    Returns (slab, [row offset per entry]).  Called once at init time.
    """
    offsets, row = [], 0
    for a in entries:
        offsets.append(row)
        row += _round_up(a.shape[0], align)
    slab = jnp.zeros((_round_up(row, align), width), dtype)
    for a, off in zip(entries, offsets):
        slab = slab.at[off:off + a.shape[0], :a.shape[1]].set(a.astype(dtype))
    return slab, offsets


def _vae_kernel(maps_ref, x_ref, eps_ref, oh_ref, sa_ref, sb_ref, out_ref,
                mf_sc, seg_sc, *, c, oa, ob):
    """Grid = (2 passes, vehicle tiles).

    pass 0: backbone + enc1-map fold (first step only) and count-normalized
            segment sums of h2 into seg_sc (VMEM scratch, persists over grid).
    pass 1: re-broadcast segment means (get_agg), enc3/enc4, fused mu/log_var
            head, reparameterization, decoder; lane-dense packed store.
    """
    f32, bf16 = jnp.float32, jnp.bfloat16
    p = pl.program_id(0)          # 0: segment-sum pass, 1: forward pass
    t = pl.program_id(1)          # vehicle tile

    def wslice(key, rows, cols):
        r = ob[key]
        return sb_ref[r:r + rows, 0:cols]

    onehot = oh_ref[0]            # (TILE_N, B_pad): onehot[j, ids[j]] = 1
    onehot_norm = oh_ref[1]       # onehot / per-sample vehicle count

    # ---- one-time: backbone stand-in (GAP -> Linear(C,512) -> ReLU), folded
    # ---- through the gather: (onehot @ feats) @ W1m == onehot @ (feats @ W1m).
    @pl.when((p == 0) & (t == 0))
    def _():
        seg_sc[...] = jnp.zeros_like(seg_sc)
        gap = jnp.mean(maps_ref[...], axis=-1).astype(bf16)           # (B_pad, C)
        wb = sa_ref[oa["wb"]:oa["wb"] + c, :]                         # (C, 512) bf16
        bb = sa_ref[oa["bb"]:oa["bb"] + 1, :].astype(f32)             # (1, 512)
        feats = jnp.maximum(
            jnp.dot(gap, wb, preferred_element_type=f32) + bb, 0.0)   # (B_pad, 512)
        w1mT = sa_ref[oa["w1mT"]:oa["w1mT"] + 16, :]                  # (16, 512) bf16
        mf_sc[...] = lax.dot_general(                                 # (B_pad, 16)
            feats.astype(bf16), w1mT, (((1,), (1,)), ((), ())),
            preferred_element_type=f32)

    # ---- per-tile encoder front (needed in both passes; the recompute in
    # ---- pass 1 is two tiny K<=16 dots, cheaper than staging h2 via HBM). ----
    # enc1 merged: x@W1_veh + onehot@mf_proj == [x | onehot] @ [W1_veh ; mf_proj]
    lhs1 = jnp.concatenate([x_ref[...], onehot], axis=1)              # (T, 6+B_pad)
    rhs1 = jnp.concatenate([wslice("w1v", 6, 16), mf_sc[...]], axis=0)
    h1 = jnp.maximum(
        jnp.dot(lhs1, rhs1, preferred_element_type=f32)
        + wslice("b1", 1, 16), 0.0)                                   # (T, 16)
    h2 = jnp.maximum(
        jnp.dot(h1, wslice("w2", 16, 16), preferred_element_type=f32)
        + wslice("b2", 1, 16), 0.0)                                   # (T, 16)

    @pl.when(p == 0)
    def _():
        # get_agg numerator: count-normalized per-sample sums of h2.
        seg_sc[...] += lax.dot_general(onehot_norm, h2, (((0,), (0,)), ((), ())),
                                       preferred_element_type=f32)
        out_ref[...] = jnp.zeros_like(out_ref)    # deterministic pass-0 writeback

    @pl.when(p == 1)
    def _():
        # get_agg: per-sample means re-broadcast to this tile's vehicles.
        agg = jnp.dot(onehot, seg_sc[...], preferred_element_type=f32)  # (T, 16)

        # enc3 on concat([h2, agg], 1) with the original (32, 32) weight.
        h3 = jnp.maximum(
            jnp.dot(jnp.concatenate([h2, agg], axis=1), wslice("w3", 32, 32),
                    preferred_element_type=f32) + wslice("b3", 1, 32), 0.0)
        h4 = jnp.maximum(
            jnp.dot(h3, wslice("w4", 32, 32), preferred_element_type=f32)
            + wslice("b4", 1, 32), 0.0)

        # Fused mu / log_var heads: one (32, 32) matmul, split by lanes.
        heads = (jnp.dot(h4, wslice("wh", 32, 32), preferred_element_type=f32)
                 + wslice("bh", 1, 32))
        mu = heads[:, 0:16]
        logvar = heads[:, 16:32]

        # Reparameterization: sample = mu + eps * exp(0.5 * log_var); decoder.
        sample = mu + eps_ref[...] * jnp.exp(0.5 * logvar)
        d1 = jnp.maximum(
            jnp.dot(sample, wslice("wd1", 16, 16), preferred_element_type=f32)
            + wslice("bd1", 1, 16), 0.0)
        dec = (jnp.dot(d1, wslice("wd2", 16, 6), preferred_element_type=f32)
               + wslice("bd2", 1, 6))                                   # (T, 6)

        # Lane-dense packed output: [dec(6) | mu(16) | logvar(16) | zero pad].
        pad = jnp.zeros((dec.shape[0], out_ref.shape[1] - 38), f32)
        out_ref[...] = jnp.concatenate([dec, mu, logvar, pad], axis=1)


def init_linear(key, in_dim, out_dim):
    """PyTorch nn.Linear-style uniform init; weight stored as (in, out)."""
    kw, kb = jax.random.split(key)
    bound = 1.0 / float(in_dim) ** 0.5
    w = jax.random.uniform(kw, (in_dim, out_dim), jnp.float32, -bound, bound)
    b = jax.random.uniform(kb, (1, out_dim), jnp.float32, -bound, bound)
    return w, b


def pack_vae_params(params):
    """ONE-TIME packing of all 18 weight/bias tensors into two lane-dense slabs."""
    (wb, bb, w1, b1, w2, b2, w3, b3, w4, b4,
     wmu, bmu, wlv, blv, wd1, bd1, wd2, bd2) = params

    w1v, w1m = w1[:6], w1[6:]                  # enc1 acts on concat([x, map_feat])
    wh = jnp.concatenate([wmu, wlv], axis=1)   # fused mu/log_var head (32, 32)
    bh = jnp.concatenate([bmu, blv], axis=1)   # (1, 32)

    # Slab A (bf16, 512 lanes): backbone weight/bias + enc1 map weight (W1m^T).
    slab_a, offs_a = _build_slab([wb, bb, w1m.T], 512, jnp.bfloat16, align=16)
    oa = dict(zip(("wb", "bb", "w1mT"), offs_a))

    # Slab B (f32, 128 lanes): all small weights/biases, sublane-stacked.
    names_b = ("w1v", "b1", "w2", "b2", "w3", "b3", "w4", "b4",
               "wh", "bh", "wd1", "bd1", "wd2", "bd2")
    slab_b, offs_b = _build_slab(
        [w1v, b1, w2, b2, w3, b3, w4, b4, wh, bh, wd1, bd1, wd2, bd2],
        128, jnp.float32, align=8)
    ob = dict(zip(names_b, offs_b))
    return slab_a, slab_b, oa, ob, int(wb.shape[0])


def make_vae_forward(params, batch_size, tile_n=128):
    """Builds the forward fn; all parameter packing happens here, once."""
    slab_a, slab_b, oa, ob, c = pack_vae_params(params)
    kernel = functools.partial(_vae_kernel, c=c, oa=oa, ob=ob)
    b_pad = _round_up(max(batch_size, 8), 8)

    @jax.jit
    def forward(maps, x, ids, eps):
        b, c_, hh, ww = maps.shape
        assert c_ == c
        hw = hh * ww
        n = x.shape[0]
        tile = min(tile_n, _round_up(max(n, 8), 8))
        n_pad = _round_up(max(n, 8), tile)
        n_tiles = n_pad // tile

        # --- per-call prep: only data-dependent tensors (padding + onehot). ---
        maps_flat = (jnp.zeros((b_pad, c_, hw), jnp.float32)
                     .at[:b].set(maps.reshape(b, c_, hw)))
        x_pad = jnp.zeros((n_pad, 6), jnp.float32).at[:n].set(x)
        eps_pad = jnp.zeros((n_pad, 16), jnp.float32).at[:n].set(eps)
        onehot = (ids[:, None] == jnp.arange(b_pad)[None, :]).astype(jnp.float32)
        counts = jnp.maximum(onehot.sum(axis=0, keepdims=True), 1.0)
        oh = (jnp.zeros((2, n_pad, b_pad), jnp.float32)
              .at[0, :n].set(onehot).at[1, :n].set(onehot / counts))

        grid = (2, n_tiles)   # (segment-sum pass / forward pass, vehicle tile)
        grid_spec = pltpu.PrefetchScalarGridSpec(
            num_scalar_prefetch=0,
            grid=grid,
            in_specs=[
                # VMEM-resident across the whole grid (constant block index):
                pl.BlockSpec((b_pad, c_, hw), lambda p, t: (0, 0, 0)),   # maps
                # Streamed per vehicle tile:
                pl.BlockSpec((tile, 6), lambda p, t: (t, 0)),            # x
                pl.BlockSpec((tile, 16), lambda p, t: (t, 0)),           # eps
                pl.BlockSpec((2, tile, b_pad), lambda p, t: (0, t, 0)),  # onehot
                # Parameter slabs, resident:
                pl.BlockSpec(slab_a.shape, lambda p, t: (0, 0)),
                pl.BlockSpec(slab_b.shape, lambda p, t: (0, 0)),
            ],
            out_specs=pl.BlockSpec((tile, 128), lambda p, t: (t, 0)),
            scratch_shapes=[
                pltpu.VMEM((b_pad, 16), jnp.float32),   # mf_proj = feats @ W1m
                pltpu.VMEM((b_pad, 16), jnp.float32),   # segment sums of h2
            ],
        )

        flops = (2 * b_pad * c_ * 512 + 2 * b_pad * 512 * 16
                 + 4 * n_pad * ((6 + b_pad) * 16 + 16 * 16)
                 + 2 * n_pad * (2 * b_pad * 16 + 3 * 32 * 32 + 16 * 16 + 16 * 6))
        bytes_accessed = int(maps_flat.size * 4 + x_pad.size * 4
                             + eps_pad.size * 4 + oh.size * 4
                             + slab_a.size * 2 + slab_b.size * 4 + n_pad * 128 * 4)

        packed = pl.pallas_call(
            kernel,
            out_shape=jax.ShapeDtypeStruct((n_pad, 128), jnp.float32),
            grid_spec=grid_spec,
            compiler_params=pltpu.CompilerParams(
                # TODO(synk): making the tile axis "parallel" (megacore / v7x
                # second TensorCore) needs a cross-core segment-sum reduction.
                dimension_semantics=("arbitrary", "arbitrary"),
                vmem_limit_bytes=32 * 1024 * 1024,
            ),
            cost_estimate=pl.CostEstimate(
                flops=flops, transcendentals=n_pad * 16,
                bytes_accessed=bytes_accessed),
        )(maps_flat, x_pad, eps_pad, oh, slab_a, slab_b)

        # Unpack the lane-dense output slab: [out(6) | mu(16) | log_var(16)].
        return packed[:n, 0:6], packed[:n, 6:22], packed[:n, 22:38]

    return forward


def vae_reference(maps, x, ids, eps, params, batch_size, bf16_backbone=False):
    """Pure-JAX reference (backbone stand-in included).

    With bf16_backbone=True the two large-K matmuls use bf16 operands with f32
    accumulation, matching the kernel's slab-A precision."""
    (wb, bb, w1, b1, w2, b2, w3, b3, w4, b4,
     wmu, bmu, wlv, blv, wd1, bd1, wd2, bd2) = params
    f32, bf16 = jnp.float32, jnp.bfloat16
    b, c, h, w = maps.shape
    gap = maps.reshape(b, c, h * w).mean(-1)
    w1v, w1m = w1[:6], w1[6:]
    if bf16_backbone:
        feats = jax.nn.relu(
            jnp.dot(gap.astype(bf16), wb.astype(bf16), preferred_element_type=f32)
            + bb.astype(bf16).astype(f32))
        mf_proj = jnp.dot(feats.astype(bf16), w1m.astype(bf16),
                          preferred_element_type=f32)
    else:
        feats = jax.nn.relu(gap @ wb + bb)
        mf_proj = feats @ w1m
    h1 = jax.nn.relu(x @ w1v + mf_proj[ids] + b1)
    h2 = jax.nn.relu(h1 @ w2 + b2)
    seg_sum = jax.ops.segment_sum(h2, ids, num_segments=batch_size)
    counts = jax.ops.segment_sum(jnp.ones((x.shape[0],)), ids,
                                 num_segments=batch_size)
    seg_mean = seg_sum / jnp.maximum(counts, 1.0)[:, None]
    agg = seg_mean[ids]
    h3 = jax.nn.relu(jnp.concatenate([h2, agg], 1) @ w3 + b3)
    h4 = jax.nn.relu(h3 @ w4 + b4)
    mu = h4 @ wmu + bmu
    logvar = h4 @ wlv + blv
    sample = mu + eps * jnp.exp(0.5 * logvar)
    d1 = jax.nn.relu(sample @ wd1 + bd1)
    out = d1 @ wd2 + bd2
    return out, mu, logvar


if __name__ == "__main__":
    key = jax.random.PRNGKey(0)
    k_maps, k_x, k_eps, k_p = jax.random.split(key, 4)

    batch_size = 2            # samples (global `batch_size` in the PyTorch code)
    n_vehicles = 8            # total vehicles across the batch
    ids = jnp.array([0, 0, 0, 1, 1, 1, 1, 1], dtype=jnp.int32)  # sorted by sample

    maps = jax.random.normal(k_maps, (batch_size, 3, 16, 16), jnp.float32)  # NCHW
    x = jax.random.normal(k_x, (n_vehicles, 6), jnp.float32)
    eps = jax.random.normal(k_eps, (n_vehicles, 16), jnp.float32)  # randn_like(std)

    keys = jax.random.split(k_p, 9)
    params = (
        *init_linear(keys[0], 3, 512),        # backbone stand-in (GAP -> 512)
        *init_linear(keys[1], 6 + 512, 16),   # enc1
        *init_linear(keys[2], 16, 16),        # enc2
        *init_linear(keys[3], 32, 32),        # enc3
        *init_linear(keys[4], 32, 32),        # enc4
        *init_linear(keys[5], 32, 16),        # mu
        *init_linear(keys[6], 32, 16),        # log_var
        *init_linear(keys[7], 16, 16),        # dec1
        *init_linear(keys[8], 16, 6),         # dec2
    )

    # One-time parameter packing + jit (review #1): nothing weight-shaped is
    # re-packed on the per-call path.
    vae_fwd = make_vae_forward(params, batch_size)

    out, mu, log_var = vae_fwd(maps, x, ids, eps)
    jax.block_until_ready((out, mu, log_var))

    assert out.shape == (n_vehicles, 6)
    assert mu.shape == (n_vehicles, 16)
    assert log_var.shape == (n_vehicles, 16)
    assert bool(jnp.all(jnp.isfinite(out)))

    # Tight check vs a reference run at matching (bf16 backbone-operand) precision.
    m_out, m_mu, m_lv = vae_reference(maps, x, ids, eps, params, batch_size,
                                      bf16_backbone=True)
    assert bool(jnp.allclose(out, m_out, rtol=2e-3, atol=2e-3))
    assert bool(jnp.allclose(mu, m_mu, rtol=2e-3, atol=2e-3))
    assert bool(jnp.allclose(log_var, m_lv, rtol=2e-3, atol=2e-3))

    # Loose sanity check vs the pure-f32 reference (bf16 backbone operands only
    # introduce sub-percent error on this network).
    r_out, r_mu, r_lv = vae_reference(maps, x, ids, eps, params, batch_size)
    assert bool(jnp.allclose(out, r_out, rtol=5e-2, atol=5e-2))
    assert bool(jnp.allclose(mu, r_mu, rtol=5e-2, atol=5e-2))
    assert bool(jnp.allclose(log_var, r_lv, rtol=5e-2, atol=5e-2))

    print("KERNEL_OK")
</pallas_src>

<mosaic_0001>
module attributes {stable_mosaic.version = 11 : i64} {
  func.func @_vae_kernel(%arg0: i32, %arg1: i32, %arg2: memref<8x3x256xf32, #tpu.memory_space<vmem>>, %arg3: memref<8x6xf32, #tpu.memory_space<vmem>>, %arg4: memref<8x16xf32, #tpu.memory_space<vmem>>, %arg5: memref<2x8x8xf32, #tpu.memory_space<vmem>>, %arg6: memref<48x512xbf16, #tpu.memory_space<vmem>>, %arg7: memref<208x128xf32, #tpu.memory_space<vmem>>, %arg8: memref<8x128xf32, #tpu.memory_space<vmem>>, %arg9: memref<8x16xf32, #tpu.memory_space<vmem>>, %arg10: memref<8x16xf32, #tpu.memory_space<vmem>>) attributes {dimension_semantics = [#tpu.dimension_semantics<arbitrary>, #tpu.dimension_semantics<arbitrary>], iteration_bounds = array<i64: 2, 1>, scalar_prefetch = 0 : i64, scratch_operands = 2 : i64, tpu.core_type = #tpu.core_type<tc>, window_params = [{pipeline_mode = #tpu.pipeline_mode<synchronous>, transform_indices = @transform_0, window_bounds = array<i64: 8, 3, 256>}, {transform_indices = @transform_1, window_bounds = array<i64: 8, 6>}, {transform_indices = @transform_2, window_bounds = array<i64: 8, 16>}, {transform_indices = @transform_3, window_bounds = array<i64: 2, 8, 8>}, {pipeline_mode = #tpu.pipeline_mode<synchronous>, transform_indices = @transform_4, window_bounds = array<i64: 48, 512>}, {pipeline_mode = #tpu.pipeline_mode<synchronous>, transform_indices = @transform_5, window_bounds = array<i64: 208, 128>}, {transform_indices = @transform_6, window_bounds = array<i64: 8, 128>}]} {
    %c0 = arith.constant 0 : index
    %c0_0 = arith.constant 0 : index
    %c0_1 = arith.constant 0 : index
    %0 = vector.load %arg5[%c0, %c0_0, %c0_1] : memref<2x8x8xf32, #tpu.memory_space<vmem>>, vector<1x8x8xf32>
    %1 = vector.shape_cast %0 : vector<1x8x8xf32> to vector<8x8xf32>
    %c1 = arith.constant 1 : index
    %c0_2 = arith.constant 0 : index
    %c0_3 = arith.constant 0 : index
    %2 = vector.load %arg5[%c1, %c0_2, %c0_3] : memref<2x8x8xf32, #tpu.memory_space<vmem>>, vector<1x8x8xf32>
    %3 = vector.shape_cast %2 : vector<1x8x8xf32> to vector<8x8xf32>
    %c0_i32 = arith.constant 0 : i32
    %4 = arith.cmpi eq, %arg0, %c0_i32 : i32
    %c0_i32_4 = arith.constant 0 : i32
    %5 = arith.cmpi eq, %arg1, %c0_i32_4 : i32
    %6 = arith.andi %4, %5 : i1
    %7 = arith.extui %6 : i1 to i32
    %c0_i32_5 = arith.constant 0 : i32
    %8 = arith.cmpi ne, %7, %c0_i32_5 : i32
    scf.if %8 {
      %cst_21 = arith.constant 0.000000e+00 : f32
      %33 = vector.broadcast %cst_21 : f32 to vector<8x16xf32>
      %c0_22 = arith.constant 0 : index
      %c0_23 = arith.constant 0 : index
      %34 = vector.load %arg10[%c0_22, %c0_23] : memref<8x16xf32, #tpu.memory_space<vmem>>, vector<8x16xf32>
      tpu.vector_store %arg10[%c0_22, %c0_23], %33 {strides = array<i32>} : memref<8x16xf32, #tpu.memory_space<vmem>>, vector<8x16xf32>,
      %c0_24 = arith.constant 0 : index
      %c0_25 = arith.constant 0 : index
      %c0_26 = arith.constant 0 : index
      %35 = vector.load %arg2[%c0_24, %c0_25, %c0_26] : memref<8x3x256xf32, #tpu.memory_space<vmem>>, vector<8x3x256xf32>
      %cst_27 = arith.constant dense<0.000000e+00> : vector<8x3xf32>
      %36 = vector.multi_reduction <add>, %35, %cst_27 [2] : vector<8x3x256xf32> to vector<8x3xf32>
      %cst_28 = arith.constant 2.560000e+02 : f32
      %37 = vector.broadcast %cst_28 : f32 to vector<8x3xf32>
      %38 = arith.divf %36, %37 : vector<8x3xf32>
      %39 = arith.truncf %38 : vector<8x3xf32> to vector<8x3xbf16>
      %c0_29 = arith.constant 0 : index
      %c0_30 = arith.constant 0 : index
      %40 = vector.load %arg6[%c0_29, %c0_30] : memref<48x512xbf16, #tpu.memory_space<vmem>>, vector<3x512xbf16>
      %c16_31 = arith.constant 16 : index
      %c0_32 = arith.constant 0 : index
      %41 = vector.load %arg6[%c16_31, %c0_32] : memref<48x512xbf16, #tpu.memory_space<vmem>>, vector<1x512xbf16>
      %42 = arith.extf %41 : vector<1x512xbf16> to vector<1x512xf32>
      %cst_33 = arith.constant dense<0.000000e+00> : vector<8x512xf32>
      %43 = tpu.matmul %39, %40, %cst_33 {dimension_numbers = #tpu.dot_dimension_numbers<[1], [0], [0], [1], [0, 0, 1, 1], [], []>} : vector<8x3xbf16>, vector<3x512xbf16>, vector<8x512xf32> -> vector<8x512xf32>
      %44 = vector.broadcast %42 : vector<1x512xf32> to vector<8x512xf32>
      %45 = arith.addf %43, %44 : vector<8x512xf32>
      %cst_34 = arith.constant 0.000000e+00 : f32
      %46 = vector.broadcast %cst_34 : f32 to vector<8x512xf32>
      %47 = arith.maximumf %45, %46 : vector<8x512xf32>
      %c32_35 = arith.constant 32 : index
      %c0_36 = arith.constant 0 : index
      %48 = vector.load %arg6[%c32_35, %c0_36] : memref<48x512xbf16, #tpu.memory_space<vmem>>, vector<16x512xbf16>
      %49 = arith.truncf %47 : vector<8x512xf32> to vector<8x512xbf16>
      %cst_37 = arith.constant dense<0.000000e+00> : vector<8x16xf32>
      %50 = tpu.matmul %49, %48, %cst_37 {dimension_numbers = #tpu.dot_dimension_numbers<[1], [1], [0], [0], [0, 0, 1, 0], [], []>} : vector<8x512xbf16>, vector<16x512xbf16>, vector<8x16xf32> -> vector<8x16xf32>
      %c0_38 = arith.constant 0 : index
      %c0_39 = arith.constant 0 : index
      %51 = vector.load %arg9[%c0_38, %c0_39] : memref<8x16xf32, #tpu.memory_space<vmem>>, vector<8x16xf32>
      tpu.vector_store %arg9[%c0_38, %c0_39], %50 {strides = array<i32>} : memref<8x16xf32, #tpu.memory_space<vmem>>, vector<8x16xf32>,
    } else {
    }
    %c0_6 = arith.constant 0 : index
    %c0_7 = arith.constant 0 : index
    %9 = vector.load %arg3[%c0_6, %c0_7] : memref<8x6xf32, #tpu.memory_space<vmem>>, vector<8x6xf32>
    %10 = tpu.concatenate %9, %1 in 1 : vector<8x6xf32>, vector<8x8xf32> -> vector<8x14xf32>
    %c0_8 = arith.constant 0 : index
    %c0_9 = arith.constant 0 : index
    %11 = vector.load %arg7[%c0_8, %c0_9] : memref<208x128xf32, #tpu.memory_space<vmem>>, vector<6x16xf32>
    %c0_10 = arith.constant 0 : index
    %c0_11 = arith.constant 0 : index
    %12 = vector.load %arg9[%c0_10, %c0_11] : memref<8x16xf32, #tpu.memory_space<vmem>>, vector<8x16xf32>
    %13 = tpu.concatenate %11, %12 in 0 : vector<6x16xf32>, vector<8x16xf32> -> vector<14x16xf32>
    %cst = arith.constant dense<0.000000e+00> : vector<8x16xf32>
    %14 = tpu.matmul %10, %13, %cst {dimension_numbers = #tpu.dot_dimension_numbers<[1], [0], [0], [1], [0, 0, 1, 1], [], []>} : vector<8x14xf32>, vector<14x16xf32>, vector<8x16xf32> -> vector<8x16xf32>
    %c8 = arith.constant 8 : index
    %c0_12 = arith.constant 0 : index
    %15 = vector.load %arg7[%c8, %c0_12] : memref<208x128xf32, #tpu.memory_space<vmem>>, vector<1x16xf32>
    %16 = vector.broadcast %15 : vector<1x16xf32> to vector<8x16xf32>
    %17 = arith.addf %14, %16 : vector<8x16xf32>
    %cst_13 = arith.constant 0.000000e+00 : f32
    %18 = vector.broadcast %cst_13 : f32 to vector<8x16xf32>
    %19 = arith.maximumf %17, %18 : vector<8x16xf32>
    %c16 = arith.constant 16 : index
    %c0_14 = arith.constant 0 : index
    %20 = vector.load %arg7[%c16, %c0_14] : memref<208x128xf32, #tpu.memory_space<vmem>>, vector<16x16xf32>
    %cst_15 = arith.constant dense<0.000000e+00> : vector<8x16xf32>
    %21 = tpu.matmul %19, %20, %cst_15 {dimension_numbers = #tpu.dot_dimension_numbers<[1], [0], [0], [1], [0, 0, 1, 1], [], []>} : vector<8x16xf32>, vector<16x16xf32>, vector<8x16xf32> -> vector<8x16xf32>
    %c32 = arith.constant 32 : index
    %c0_16 = arith.constant 0 : index
    %22 = vector.load %arg7[%c32, %c0_16] : memref<208x128xf32, #tpu.memory_space<vmem>>, vector<1x16xf32>
    %23 = vector.broadcast %22 : vector<1x16xf32> to vector<8x16xf32>
    %24 = arith.addf %21, %23 : vector<8x16xf32>
    %cst_17 = arith.constant 0.000000e+00 : f32
    %25 = vector.broadcast %cst_17 : f32 to vector<8x16xf32>
    %26 = arith.maximumf %24, %25 : vector<8x16xf32>
    %c0_i32_18 = arith.constant 0 : i32
    %27 = arith.cmpi eq, %arg0, %c0_i32_18 : i32
    %28 = arith.extui %27 : i1 to i32
    %c0_i32_19 = arith.constant 0 : i32
    %29 = arith.cmpi ne, %28, %c0_i32_19 : i32
    scf.if %29 {
      %c0_21 = arith.constant 0 : index
      %c0_22 = arith.constant 0 : index
      %33 = vector.load %arg10[%c0_21, %c0_22] : memref<8x16xf32, #tpu.memory_space<vmem>>, vector<8x16xf32>
      %cst_23 = arith.constant dense<0.000000e+00> : vector<8x16xf32>
      %34 = tpu.matmul %3, %26, %cst_23 {dimension_numbers = #tpu.dot_dimension_numbers<[0], [0], [1], [1], [0, 1, 1, 1], [], []>} : vector<8x8xf32>, vector<8x16xf32>, vector<8x16xf32> -> vector<8x16xf32>
      %35 = arith.addf %33, %34 : vector<8x16xf32>
      %c0_24 = arith.constant 0 : index
      %c0_25 = arith.constant 0 : index
      %36 = vector.load %arg10[%c0_24, %c0_25] : memref<8x16xf32, #tpu.memory_space<vmem>>, vector<8x16xf32>
      tpu.vector_store %arg10[%c0_24, %c0_25], %35 {strides = array<i32>} : memref<8x16xf32, #tpu.memory_space<vmem>>, vector<8x16xf32>,
      %cst_26 = arith.constant 0.000000e+00 : f32
      %37 = vector.broadcast %cst_26 : f32 to vector<8x128xf32>
      %c0_27 = arith.constant 0 : index
      %c0_28 = arith.constant 0 : index
      %38 = vector.load %arg8[%c0_27, %c0_28] : memref<8x128xf32, #tpu.memory_space<vmem>>, vector<8x128xf32>
      tpu.vector_store %arg8[%c0_27, %c0_28], %37 {strides = array<i32>} : memref<8x128xf32, #tpu.memory_space<vmem>>, vector<8x128xf32>,
    } else {
    }
    %c1_i32 = arith.constant 1 : i32
    %30 = arith.cmpi eq, %arg0, %c1_i32 : i32
    %31 = arith.extui %30 : i1 to i32
    %c0_i32_20 = arith.constant 0 : i32
    %32 = arith.cmpi ne, %31, %c0_i32_20 : i32
    scf.if %32 {
      %c0_21 = arith.constant 0 : index
      %c0_22 = arith.constant 0 : index
      %33 = vector.load %arg10[%c0_21, %c0_22] : memref<8x16xf32, #tpu.memory_space<vmem>>, vector<8x16xf32>
      %cst_23 = arith.constant dense<0.000000e+00> : vector<8x16xf32>
      %34 = tpu.matmul %1, %33, %cst_23 {dimension_numbers = #tpu.dot_dimension_numbers<[1], [0], [0], [1], [0, 0, 1, 1], [], []>} : vector<8x8xf32>, vector<8x16xf32>, vector<8x16xf32> -> vector<8x16xf32>
      %35 = tpu.concatenate %26, %34 in 1 : vector<8x16xf32>, vector<8x16xf32> -> vector<8x32xf32>
      %c40 = arith.constant 40 : index
      %c0_24 = arith.constant 0 : index
      %36 = vector.load %arg7[%c40, %c0_24] : memref<208x128xf32, #tpu.memory_space<vmem>>, vector<32x32xf32>
      %cst_25 = arith.constant dense<0.000000e+00> : vector<8x32xf32>
      %37 = tpu.matmul %35, %36, %cst_25 {dimension_numbers = #tpu.dot_dimension_numbers<[1], [0], [0], [1], [0, 0, 1, 1], [], []>} : vector<8x32xf32>, vector<32x32xf32>, vector<8x32xf32> -> vector<8x32xf32>
      %c72 = arith.constant 72 : index
      %c0_26 = arith.constant 0 : index
      %38 = vector.load %arg7[%c72, %c0_26] : memref<208x128xf32, #tpu.memory_space<vmem>>, vector<1x32xf32>
      %39 = vector.broadcast %38 : vector<1x32xf32> to vector<8x32xf32>
      %40 = arith.addf %37, %39 : vector<8x32xf32>
      %cst_27 = arith.constant 0.000000e+00 : f32
      %41 = vector.broadcast %cst_27 : f32 to vector<8x32xf32>
      %42 = arith.maximumf %40, %41 : vector<8x32xf32>
      %c80 = arith.constant 80 : index
      %c0_28 = arith.constant 0 : index
      %43 = vector.load %arg7[%c80, %c0_28] : memref<208x128xf32, #tpu.memory_space<vmem>>, vector<32x32xf32>
      %cst_29 = arith.constant dense<0.000000e+00> : vector<8x32xf32>
      %44 = tpu.matmul %42, %43, %cst_29 {dimension_numbers = #tpu.dot_dimension_numbers<[1], [0], [0], [1], [0, 0, 1, 1], [], []>} : vector<8x32xf32>, vector<32x32xf32>, vector<8x32xf32> -> vector<8x32xf32>
      %c112 = arith.constant 112 : index
      %c0_30 = arith.constant 0 : index
      %45 = vector.load %arg7[%c112, %c0_30] : memref<208x128xf32, #tpu.memory_space<vmem>>, vector<1x32xf32>
      %46 = vector.broadcast %45 : vector<1x32xf32> to vector<8x32xf32>
      %47 = arith.addf %44, %46 : vector<8x32xf32>
      %cst_31 = arith.constant 0.000000e+00 : f32
      %48 = vector.broadcast %cst_31 : f32 to vector<8x32xf32>
      %49 = arith.maximumf %47, %48 : vector<8x32xf32>
      %c120 = arith.constant 120 : index
      %c0_32 = arith.constant 0 : index
      %50 = vector.load %arg7[%c120, %c0_32] : memref<208x128xf32, #tpu.memory_space<vmem>>, vector<32x32xf32>
      %cst_33 = arith.constant dense<0.000000e+00> : vector<8x32xf32>
      %51 = tpu.matmul %49, %50, %cst_33 {dimension_numbers = #tpu.dot_dimension_numbers<[1], [0], [0], [1], [0, 0, 1, 1], [], []>} : vector<8x32xf32>, vector<32x32xf32>, vector<8x32xf32> -> vector<8x32xf32>
      %c152 = arith.constant 152 : index
      %c0_34 = arith.constant 0 : index
      %52 = vector.load %arg7[%c152, %c0_34] : memref<208x128xf32, #tpu.memory_space<vmem>>, vector<1x32xf32>
      %53 = vector.broadcast %52 : vector<1x32xf32> to vector<8x32xf32>
      %54 = arith.addf %51, %53 : vector<8x32xf32>
      %55 = vector.extract_strided_slice %54 {offsets = [0, 0], sizes = [8, 16], strides = [1, 1]} : vector<8x32xf32> to vector<8x16xf32>
      %56 = vector.extract_strided_slice %54 {offsets = [0, 16], sizes = [8, 16], strides = [1, 1]} : vector<8x32xf32> to vector<8x16xf32>
      %c0_35 = arith.constant 0 : index
      %c0_36 = arith.constant 0 : index
      %57 = vector.load %arg4[%c0_35, %c0_36] : memref<8x16xf32, #tpu.memory_space<vmem>>, vector<8x16xf32>
      %cst_37 = arith.constant 5.000000e-01 : f32
      %58 = vector.broadcast %cst_37 : f32 to vector<8x16xf32>
      %59 = arith.mulf %58, %56 : vector<8x16xf32>
      %60 = math.exp %59 : vector<8x16xf32>
      %61 = arith.mulf %57, %60 : vector<8x16xf32>
      %62 = arith.addf %55, %61 : vector<8x16xf32>
      %c160 = arith.constant 160 : index
      %c0_38 = arith.constant 0 : index
      %63 = vector.load %arg7[%c160, %c0_38] : memref<208x128xf32, #tpu.memory_space<vmem>>, vector<16x16xf32>
      %cst_39 = arith.constant dense<0.000000e+00> : vector<8x16xf32>
      %64 = tpu.matmul %62, %63, %cst_39 {dimension_numbers = #tpu.dot_dimension_numbers<[1], [0], [0], [1], [0, 0, 1, 1], [], []>} : vector<8x16xf32>, vector<16x16xf32>, vector<8x16xf32> -> vector<8x16xf32>
      %c176 = arith.constant 176 : index
      %c0_40 = arith.constant 0 : index
      %65 = vector.load %arg7[%c176, %c0_40] : memref<208x128xf32, #tpu.memory_space<vmem>>, vector<1x16xf32>
      %66 = vector.broadcast %65 : vector<1x16xf32> to vector<8x16xf32>
      %67 = arith.addf %64, %66 : vector<8x16xf32>
      %cst_41 = arith.constant 0.000000e+00 : f32
      %68 = vector.broadcast %cst_41 : f32 to vector<8x16xf32>
      %69 = arith.maximumf %67, %68 : vector<8x16xf32>
      %c184 = arith.constant 184 : index
      %c0_42 = arith.constant 0 : index
      %70 = vector.load %arg7[%c184, %c0_42] : memref<208x128xf32, #tpu.memory_space<vmem>>, vector<16x6xf32>
      %cst_43 = arith.constant dense<0.000000e+00> : vector<8x6xf32>
      %71 = tpu.matmul %69, %70, %cst_43 {dimension_numbers = #tpu.dot_dimension_numbers<[1], [0], [0], [1], [0, 0, 1, 1], [], []>} : vector<8x16xf32>, vector<16x6xf32>, vector<8x6xf32> -> vector<8x6xf32>
      %c200 = arith.constant 200 : index
      %c0_44 = arith.constant 0 : index
      %72 = vector.load %arg7[%c200, %c0_44] : memref<208x128xf32, #tpu.memory_space<vmem>>, vector<1x6xf32>
      %73 = vector.broadcast %72 : vector<1x6xf32> to vector<8x6xf32>
      %74 = arith.addf %71, %73 : vector<8x6xf32>
      %cst_45 = arith.constant 0.000000e+00 : f32
      %75 = vector.broadcast %cst_45 : f32 to vector<8x90xf32>
      %76 = tpu.concatenate %74, %55, %56, %75 in 1 : vector<8x6xf32>, vector<8x16xf32>, vector<8x16xf32>, vector<8x90xf32> -> vector<8x128xf32>
      %c0_46 = arith.constant 0 : index
      %c0_47 = arith.constant 0 : index
      %77 = vector.load %arg8[%c0_46, %c0_47] : memref<8x128xf32, #tpu.memory_space<vmem>>, vector<8x128xf32>
      tpu.vector_store %arg8[%c0_46, %c0_47], %76 {strides = array<i32>} : memref<8x128xf32, #tpu.memory_space<vmem>>, vector<8x128xf32>,
    } else {
    }
    return
  }
  func.func @transform_0(%arg0: i32, %arg1: i32) -> (i32, i32, i32) {
    %c0_i32 = arith.constant 0 : i32
    %c0_i32_0 = arith.constant 0 : i32
    %c0_i32_1 = arith.constant 0 : i32
    %c0_i32_2 = arith.constant 0 : i32
    return %c0_i32, %c0_i32_0, %c0_i32_1 : i32, i32, i32
  }
  func.func @transform_1(%arg0: i32, %arg1: i32) -> (i32, i32) {
    %c0_i32 = arith.constant 0 : i32
    %c0_i32_0 = arith.constant 0 : i32
    return %arg1, %c0_i32 : i32, i32
  }
  func.func @transform_2(%arg0: i32, %arg1: i32) -> (i32, i32) {
    %c0_i32 = arith.constant 0 : i32
    %c0_i32_0 = arith.constant 0 : i32
    return %arg1, %c0_i32 : i32, i32
  }
  func.func @transform_3(%arg0: i32, %arg1: i32) -> (i32, i32, i32) {
    %c0_i32 = arith.constant 0 : i32
    %c0_i32_0 = arith.constant 0 : i32
    %c0_i32_1 = arith.constant 0 : i32
    return %c0_i32, %arg1, %c0_i32_0 : i32, i32, i32
  }
  func.func @transform_4(%arg0: i32, %arg1: i32) -> (i32, i32) {
    %c0_i32 = arith.constant 0 : i32
    %c0_i32_0 = arith.constant 0 : i32
    %c0_i32_1 = arith.constant 0 : i32
    return %c0_i32, %c0_i32_0 : i32, i32
  }
  func.func @transform_5(%arg0: i32, %arg1: i32) -> (i32, i32) {
    %c0_i32 = arith.constant 0 : i32
    %c0_i32_0 = arith.constant 0 : i32
    %c0_i32_1 = arith.constant 0 : i32
    return %c0_i32, %c0_i32_0 : i32, i32
  }
  func.func @transform_6(%arg0: i32, %arg1: i32) -> (i32, i32) {
    %c0_i32 = arith.constant 0 : i32
    %c0_i32_0 = arith.constant 0 : i32
    return %arg1, %c0_i32 : i32, i32
  }
}

</mosaic_0001>

<bundles_post_ra>
// kernel: forward.1
= control target key start
LH: loop header
LB: loop body
LE: loop exit
PB: predicated region body
PF: predicated region fallthrough
CT: control target
= control target key end

     0   :  { %s1915_s21 = smov 0   ;;  %s1917_s22 = smov 0   ;;  %s2149_s0 = inlined_call_operand.vmem [shape: f32[8,3,256], index: 0, kind: input, shape index: {}]   ;;  %s2150_s1 = inlined_call_operand.vmem [shape: f32[8,6], index: 1, kind: input, shape index: {}]   ;;  %s2151_s2 = inlined_call_operand.vmem [shape: f32[8,16], index: 2, kind: input, shape index: {}]   ;;  %s2152_s3 = inlined_call_operand.vmem [shape: f32[2,8,8], index: 3, kind: input, shape index: {}]   ;;  %s2153_s4 = inlined_call_operand.vmem [shape: bf16[48,512], index: 4, kind: input, shape index: {}]   ;;  %s2154_s5 = inlined_call_operand.vmem [shape: f32[208,128], index: 5, kind: input, shape index: {}]   ;;  %s2155_s6 = inlined_call_operand.vmem [shape: f32[8,128], index: 6, kind: output, shape index: {}]  }
   0x1   :  { %s1919_s23 = smov 0  }
   0x2 LB: > { %s28_s24 = sadd.s32 1, %s1858_s22  ;;  %p1610_p0 = scmp.ge.s32.totalorder %s1862_s23, 1  ;;  %s1862_s23 = sphi %s1919_s23, %s16_s23   ;;  %s1858_s22 = sphi %s1917_s22, %s2157_s22   ;;  %s1854_s21 = sphi %s1915_s21, %s2156_s21  }
   0x3   : > { %p30_p1 = scmp.ge.s32.totalorder %s28_s24, 2  ;;  %p241_p2 = scmp.lt.s32.totalorder %s1862_s23, 3 }
   0x5   : > { %s2159_s24 = smov (%p30_p1, %s28_s24), 0  ;;  %p242_p3 = pnand %p1610_p0, %p241_p2 }
   0x6   : > { %v1938_v0 = vld [vmem:[%s2152_s3] sm:$0xff] (!%p242_p3)  ;;  %v1943_v1 = vld [vmem:[%s2152_s3 + $0x8] sm:$0xff] (!%p242_p3)  ;;  %p297_p4 = scmp.eq.s32.totalorder (!%p242_p3), %s1854_s21, 0 }
   0x7   : > { %245 = sbr.rel (%p242_p3) target bundleno = 2936 (0xb78), region = 44 }
   0xe   : > { %302 = sbr.rel (!%p297_p4) target bundleno = 621 (0x26d), region = 48  ;;  %v305_v2 = vld [vmem:[%s2149_s0] sm:$0x77] (%p297_p4)  ;;  %vm337_vm0 = vcmask (%p297_p4), 1042432   ;;  %v307_v3 = vld [vmem:[%s2149_s0 + $0x10] sm:$0x77] (%p297_p4)  ;;  %v403_v56 = vlaneseq (%p297_p4) }
   0xf   : > { %v321_v4 = vcombine.high (%p297_p4), %v305_v2, %v305_v2  ;;  %v338_v5 = vsel (%p297_p4), %vm337_vm0, %v305_v2, 0.0  ;;  %v323_v6 = vcombine.high (%p297_p4), %v307_v3, %v307_v3  ;;  %v348_v7 = vsel (%p297_p4), %vm337_vm0, %v307_v3, 0.0  ;;  %v306_v8 = vld [vmem:[%s2149_s0 + $0x8] sm:$0x77] (%p297_p4)  ;;  %v308_v9 = vld [vmem:[%s2149_s0 + $0x18] sm:$0x77] (%p297_p4) }
  0x10   : > { %v322_v10 = vcombine.high (%p297_p4), %v306_v8, %v306_v8  ;;  %v343_v11 = vsel (%p297_p4), %vm337_vm0, %v306_v8, 0.0  ;;  %v324_v12 = vcombine.high (%p297_p4), %v308_v9, %v308_v9  ;;  %v309_v13 = vld [vmem:[%s2149_s0 + $0x20] sm:$0x77] (%p297_p4)  ;;  %v310_v14 = vld [vmem:[%s2149_s0 + $0x28] sm:$0x77] (%p297_p4)  ;;  %v353_v17 = vsel (%p297_p4), %vm337_vm0, %v308_v9, 0.0 }
  0x11   : > { %v339_v15 = vsel (%p297_p4), %vm337_vm0, %v321_v4, 0.0  ;;  %v349_v16 = vsel (%p297_p4), %vm337_vm0, %v323_v6, 0.0  ;;  %v325_v18 = vcombine.high (%p297_p4), %v309_v13, %v309_v13  ;;  %v311_v19 = vld [vmem:[%s2149_s0 + $0x30] sm:$0x77] (%p297_p4)  ;;  %v312_v24 = vld [vmem:[%s2149_s0 + $0x38] sm:$0x77] (%p297_p4)  ;;  %v326_v25 = vcombine.high (%p297_p4), %v310_v14, %v310_v14 }
  0x12   : > { %v340_v20 = vadd.f32 (%p297_p4), %v339_v15, %v338_v5  ;;  %v350_v21 = vadd.f32 (%p297_p4), %v349_v16, %v348_v7  ;;  %v344_v22 = vsel (%p297_p4), %vm337_vm0, %v322_v10, 0.0  ;;  %v354_v23 = vsel (%p297_p4), %vm337_vm0, %v324_v12, 0.0  ;;  %v395_v42 = vld [vmem:[%s2153_s4] sm:$0x33] (%p297_p4)  ;;  %v396_v43 = vld [vmem:[%s2153_s4 + $0x8] sm:$0x33] (%p297_p4) }
  0x13   : > { %v345_v26 = vadd.f32 (%p297_p4), %v344_v22, %v343_v11  ;;  %v355_v27 = vadd.f32 (%p297_p4), %v354_v23, %v353_v17  ;;  %v358_v28 = vsel (%p297_p4), %vm337_vm0, %v309_v13, 0.0  ;;  %v359_v29 = vsel (%p297_p4), %vm337_vm0, %v325_v18, 0.0 }
  0x14   : > { %341 = vadd.xlane.f32.xlu0 (%p297_p4), %v340_v20  ;;  %351 = vadd.xlane.f32.xlu1 (%p297_p4), %v350_v21  ;;  %v363_v30 = vsel (%p297_p4), %vm337_vm0, %v310_v14, 0.0  ;;  %v364_v31 = vsel (%p297_p4), %vm337_vm0, %v326_v25, 0.0  ;;  %v327_v32 = vcombine.high (%p297_p4), %v311_v19, %v311_v19  ;;  %v328_v33 = vcombine.high (%p297_p4), %v312_v24, %v312_v24 }
  0x15   : > { %v360_v34 = vadd.f32 %v359_v29, %v358_v28  ;;  %v365_v35 = vadd.f32 %v364_v31, %v363_v30  ;;  %v368_v36 = vsel %vm337_vm0, %v311_v19, 0.0  ;;  %v373_v38 = vsel %vm337_vm0, %v312_v24, 0.0 }
  0x16   : > { %v369_v37 = vsel %vm337_vm0, %v327_v32, 0.0  ;;  %v374_v39 = vsel %vm337_vm0, %v328_v33, 0.0  ;;  %vm498_vm1 = vcmask 1040384   ;;  %v1614_v44 = vcombine.high %v395_v42, %v395_v42 }
  0x17   : > { %v370_v40 = vadd.f32 %v369_v37, %v368_v36  ;;  %v375_v41 = vadd.f32 %v374_v39, %v373_v38  ;;  %vm499_vm2 = vcmask 1041408   ;;  %v1864_v45 = vmov 65535  }
  0x18   : > { %346 = vadd.xlane.f32.xlu0 %v345_v26  ;;  %356 = vadd.xlane.f32.xlu1 %v355_v27  ;;  %v500_v46 = vsel %vm498_vm1, 4294967295, %v1864_v45  ;;  %v1616_v48 = vcombine.high %v396_v43, %v396_v43  ;;  %v1613_v49 = vcombine.low %v395_v42, %v395_v42  ;;  %v1615_v51 = vcombine.low %v396_v43, %v396_v43 }
  0x19   : > { %v501_v47 = vsel %vm499_vm2, %v500_v46, 0  ;;  %v1865_v55 = vmov 0   ;;  %v1992_v61 = vshrl.u32 %v403_v56, 7  ;;  %v436_v62 = vand.u32 127, %v403_v56  ;;  %v1834_v46 = vld [vmem:[%s2153_s4 + $0x44] ss:$16 sps:$4 sm:$0xff]  }
  0x1a   : > { %v506_v50 = vand.u32 %v1614_v44, %v501_v47  ;;  %v512_v52 = vand.u32 %v1616_v48, %v501_v47  ;;  %v503_v53 = vand.u32 %v1613_v49, %v501_v47  ;;  %v509_v54 = vand.u32 %v1615_v51, %v501_v47  ;;  %546 = vmatprep.mubr.bf16.mxu0 %v1865_v55  ;;  %v1837_v47 = vld [vmem:[%s2153_s4 + $0x4c] ss:$16 sps:$4 sm:$0xff]   ;;  %v1832_v48 = vld [vmem:[%s2153_s4 + $0x40] ss:$16 sps:$4 sm:$0xff]   ;;  %v1835_v49 = vld [vmem:[%s2153_s4 + $0x48] ss:$16 sps:$4 sm:$0xff]  }
  0x1b   : > { %587 = vmatprep.mubr.bf16.mxu1 %v1865_v55  ;;  %v439_v7 = vsub.s32 %v436_v62, %v1992_v61  ;;  %vm469_vm3 = vcmask 1041409   ;;  %vm471_vm4 = vcmask 1042434   ;;  %vm473_vm5 = vcmask 1043459   ;;  %v398_v51 = vld [vmem:[%s2153_s4 + $0x28] sm:$0x11] }
  0x1c   : > { %361 = vadd.xlane.f32.xlu0 %v360_v34  ;;  %366 = vadd.xlane.f32.xlu1 %v365_v35  ;;  %vm475_vm6 = vcmask 1044484   ;;  %vm477_vm7 = vcmask 1045509   ;;  %vm479_vm8 = vcmask 1046534   ;;  %vm481_vm9 = vcmask 1047559  }
  0x1d   : > { %514 = vmatprep.subr.bf16.mxu0 %v506_v50  ;;  %555 = vmatprep.subr.bf16.mxu1 %v512_v52  ;;  %vm494_vm10 = vcmask 23552   ;;  %v397_v50 = vld [vmem:[%s2153_s4 + $0x20] sm:$0x11]  ;;  %v402_v56 = vunpack.c.h.bf16 %v398_v51  ;;  %vm303_vm11 = vcmask 130048  }
  0x1e   : > { %515 = vmatpush1.bf16.msra.mxu0 %v503_v53  ;;  %556 = vmatpush1.bf16.msra.mxu1 %v509_v54  ;;  %v399_v52 = vunpack.c.l.bf16 %v397_v50  ;;  %v405_v53 = vsub.s32 0, %v1992_v61  ;;  %v401_v54 = vunpack.c.l.bf16 %v398_v51  ;;  %v400_v55 = vunpack.c.h.bf16 %v397_v50 }
  0x1f   : > { %628 = vmatprep.subr.bf16.mxu1 %v1834_v46  ;;  %668 = vmatprep.subr.bf16.mxu0 %v1837_v47 }
  0x20   : > { %371 = vadd.xlane.f32.xlu0 %v370_v40  ;;  %376 = vadd.xlane.f32.xlu1 %v375_v41 }
  0xa1   : > { %v342_v57 = vpop.xlane.xlu0 %341  ;;  %v352_v58 = vpop.xlane.xlu1 %351 }
  0xa2   : > { %v379_v59 = vmul.f32 0.00390625, %v342_v57  ;;  %v381_v60 = vmul.f32 0.00390625, %v352_v58  ;;  %v406_v57 = vrot.slane %v399_v52, %v405_v53  ;;  %v414_v58 = vrot.slane %v401_v54, %v405_v53 }
  0xa4   : > { %v387_v63 = vpack.c.bf16 %v379_v59, %v379_v59  ;;  %v389_v2 = vpack.c.bf16 %v381_v60, %v381_v60  ;;  %v410_v59 = vrot.slane %v400_v55, %v405_v53  ;;  %v418_v60 = vrot.slane %v402_v56, %v405_v53 }
  0xa5   : > { %v347_v3 = vpop.xlane.xlu0 %346  ;;  %v357_v4 = vpop.xlane.xlu1 %356 }
  0xa6   : > { %v380_v5 = vmul.f32 0.00390625, %v347_v3  ;;  %v382_v6 = vmul.f32 0.00390625, %v357_v4  ;;  %v427_v8 = vunpack.c.l.b16 %v387_v63  ;;  %v429_v11 = vunpack.c.l.b16 %v389_v2 }
  0xa8   : > { %v388_v9 = vpack.c.bf16 %v380_v5, %v380_v5  ;;  %v390_v10 = vpack.c.bf16 %v382_v6, %v382_v6  ;;  %v440_v18 = vrot.slane %v427_v8, %v439_v7  ;;  %v448_v23 = vrot.slane %v429_v11, %v439_v7 }
  0xa9   : > { %v362_v12 = vpop.xlane.xlu0 %361  ;;  %v367_v13 = vpop.xlane.xlu1 %366 }
  0xaa   : > { %v428_v14 = vunpack.c.l.b16 %v388_v9  ;;  %v430_v15 = vunpack.c.l.b16 %v390_v10  ;;  %v383_v16 = vmul.f32 0.00390625, %v362_v12  ;;  %v384_v17 = vmul.f32 0.00390625, %v367_v13 }
  0xac   : > { %v444_v19 = vrot.slane %v428_v14, %v439_v7  ;;  %v452_v20 = vrot.slane %v430_v15, %v439_v7  ;;  %v391_v21 = vpack.c.bf16 %v383_v16, %v383_v16  ;;  %v392_v22 = vpack.c.bf16 %v384_v17, %v384_v17 }
  0xad   : > { %v372_v24 = vpop.xlane.xlu0 %371  ;;  %v377_v25 = vpop.xlane.xlu1 %376 }
  0xae   : > { %v470_v26 = vsel %vm469_vm3, %v444_v19, %v440_v18  ;;  %v431_v27 = vunpack.c.l.b16 %v391_v21  ;;  %v432_v28 = vunpack.c.l.b16 %v392_v22  ;;  %v385_v29 = vmul.f32 0.00390625, %v372_v24 }
  0xaf   : > { %v472_v30 = vsel %vm471_vm4, %v448_v23, %v470_v26  ;;  %v386_v31 = vmul.f32 0.00390625, %v377_v25  ;;  %v1866_v19 = vmov 0.0  }
  0xb0   : > { %v474_v32 = vsel %vm473_vm5, %v452_v20, %v472_v30  ;;  %v456_v33 = vrot.slane %v431_v27, %v439_v7  ;;  %v393_v34 = vpack.c.bf16 %v385_v29, %v385_v29  ;;  %v460_v35 = vrot.slane %v432_v28, %v439_v7  ;;  %304 = vst.msk [vmem:[#allocation3] sm:$0xff] %vm303_vm11, %v1866_v19 }
  0xb1   : > { %v394_v36 = vpack.c.bf16 %v386_v31, %v386_v31 }
  0xb2   : > { %v476_v37 = vsel %vm475_vm6, %v456_v33, %v474_v32  ;;  %v433_v38 = vunpack.c.l.b16 %v393_v34 }
  0xb3   : > { %v434_v39 = vunpack.c.l.b16 %v394_v36  ;;  %v478_v41 = vsel %vm477_vm7, %v460_v35, %v476_v37 }
  0xb4   : > { %v464_v40 = vrot.slane %v433_v38, %v439_v7 }
  0xb5   : > { %v468_v42 = vrot.slane %v434_v39, %v439_v7 }
  0xb6   : > { %v480_v43 = vsel %vm479_vm8, %v464_v40, %v478_v41 }
  0xb7   : > { %v482_v44 = vsel %vm481_vm9, %v468_v42, %v480_v43 }
  0xb8   : > { %v483_v45 = vpack.c.b16 %v482_v44, %v482_v44 }
  0xba   : > { %1617 = vmatmul.mubr.msk.bf16.vlgmr.msra.gmra.mrb[0].mxu0 %vm494_vm10, %v483_v45  ;;  %1618 = vmatmul.mubr.msk.bf16.vlgmr.msra.gmra.mrb[0].mxu1 %vm494_vm10, %v483_v45 }
  0xbb   : > { %629 = vmatpush1.bf16.xpose.msra.mxu1 %v1832_v48  ;;  %669 = vmatpush1.bf16.xpose.msra.mxu0 %v1835_v49 }
 0x18d   : > { %v548_v62 = vpop.f32.mrb[0].mxu0  ;;  %v589_v63 = vpop.f32.mrb[0].mxu1 }
 0x18e   : > { %v549_v2 = vadd.f32 %v548_v62, %v406_v57  ;;  %v590_v3 = vadd.f32 %v589_v63, %v414_v58  ;;  %v550_v4 = vpop.f32.mrb[1].mxu0  ;;  %v591_v5 = vpop.f32.mrb[1].mxu1 }
 0x18f   : > { %v551_v6 = vadd.f32 %v550_v4, %v410_v59  ;;  %v592_v7 = vadd.f32 %v591_v5, %v418_v60  ;;  %v552_v8 = vpop.f32.mrb[2].mxu0  ;;  %v593_v9 = vpop.f32.mrb[2].mxu1 }
 0x190   : > { %v596_v10 = vmax.f32 %v549_v2, 0.0  ;;  %v598_v11 = vmax.f32 %v590_v3, 0.0  ;;  %v553_v61 = vpop.f32.mrb[3].mxu0  ;;  %v594_v12 = vpop.f32.mrb[3].mxu1 }
 0x191   : > { %v597_v13 = vmax.f32 %v551_v6, 0.0  ;;  %v599_v14 = vmax.f32 %v592_v7, 0.0 }
 0x192   : > { %v604_v17 = vpack.c.bf16 %v596_v10, %v596_v10  ;;  %v606_v18 = vpack.c.bf16 %v598_v11, %v598_v11 }
 0x193   : > { %v605_v15 = vpack.c.bf16 %v597_v13, %v597_v13  ;;  %v607_v16 = vpack.c.bf16 %v599_v14, %v599_v14 }
 0x195   : > { %660 = vmatprep.mubr.bf16.mxu1 %v605_v15  ;;  %700 = vmatprep.mubr.bf16.mxu0 %v607_v16 }
 0x196   : > { %661 = vmatmul.mubr.bf16.vlgmr.msra.gmra.mrb[4].mxu1 %v604_v17  ;;  %701 = vmatmul.mubr.bf16.vlgmr.msra.gmra.mrb[4].mxu0 %v606_v18 }
 0x269   : > { %v662_v20 = vpop.f32.mrb[4].mxu1  ;;  %v702_v21 = vpop.f32.mrb[4].mxu0 }
 0x26a   : > { %v703_v22 = vadd.f32 %v702_v21, %v662_v20  ;;  %v664_v23 = vpop.f32.mrb[5].mxu1  ;;  %v704_v24 = vpop.f32.mrb[5].mxu0 }
 0x26b   : > { %v665_v25 = vpop.f32.mrb[6].mxu1  ;;  %v705_v26 = vpop.f32.mrb[6].mxu0 }
 0x26c   : > { %708 = vst.msk [vmem:[#allocation2] sm:$0xff] %vm303_vm11, %v703_v22  ;;  %v666_v27 = vpop.f32.mrb[7].mxu1  ;;  %v706_v28 = vpop.f32.mrb[7].mxu0 }
 0x26d PF: > { %v716_v29 = vld [vmem:[%s2154_s5] sm:$0x3f]  ;;  %vm721_vm12 = vcmask 1045504   ;;  %s1867_s19 = smov 6   ;;  %v1868_v31 = vmov 0.0|0.0   ;;  %vm1869_vm13 = vmmov 1  }
 0x26e   : > { %711 = vrot.lane.b32.xlu0 %v1938_v0, %s1867_s19  ;;  %1748 = vmatprep.subr.bf16.mxu0 %v1868_v31  ;;  %vm1750_vm14 = vmpackc.low %vm721_vm12, %vm1869_vm13  ;;  %vm1870_vm15 = vmmov 0   ;;  %v1871_v34 = vmov 0.0   ;;  %v709_v36 = vld [vmem:[%s2150_s1] sm:$0xff]  ;;  %vm714_vm0 = vcmask 48128   ;;  %vm728_vm1 = vcmask 113664   ;;  %v805_v39 = vld [vmem:[%s2154_s5 + $0x10] sm:$0xff] }
 0x26f   : > { %1752 = vmatprep.subr.bf16.mxu1 %v1868_v31  ;;  %1681 = vmatprep.mubr.msk.f32.mxu0 %vm1870_vm15, %v1871_v34  ;;  %v806_v40 = vld [vmem:[%s2154_s5 + $0x18] sm:$0xff]  ;;  %v1623_v42 = vld [vmem:[%s2154_s5 + $0x8] ss:$0 sm:$0xff]  ;;  %vm812_vm2 = vcmask 130048   ;;  %v1626_v47 = vld [vmem:[%s2154_s5 + $0x20] ss:$0 sm:$0xff] }
 0x270   : > { %1688 = vmatprep.mubr.msk.f32.mxu1 %vm1870_vm15, %v1871_v34  ;;  %v1753_v41 = vpack.c.bf16 %v806_v40, %v805_v39  ;;  %p1628_p5 = scmp.ne.s32.totalorder %s1854_s21, 0 }
 0x271   : > { %v1872_v52 = vmov (!%p1628_p5), 0.0   ;;  %vm1873_vm3 = vmmov (!%p1628_p5), 0   ;;  %vm923_vm4 = vcmask (!%p1628_p5), 64512   ;;  %v890_v54 = vld [vmem:[#allocation3] sm:$0xff] (!%p1628_p5) }
 0x272   : > { %1754 = vmatpush3.bf16.msra.mxu1 %v1753_v41  ;;  %999 = vst [vmem:[%s2155_s6] sm:$0xff] (!%p1628_p5), %v1872_v52 }
 0x273   : > { %v717_v30 = vld [vmem:[#allocation2] sm:$0xff] }
 0x274   : > { %v719_v32 = vrot.slane %v717_v30, 2 }
 0x276   : > { %v722_v33 = vsel %vm721_vm12, %v716_v29, %v719_v32 }
 0x277   : > { %v1749_v35 = vpack.c.bf16 %v719_v32, %v722_v33 }
 0x279   : > { %1751 = vmatpush3.bf16.msk.msra.mxu0 %vm1750_vm14, %v1749_v35 }
 0x27a   : > { %1691 = vmatprep.subr.mxu0 (!%p1628_p5), %v1872_v52 }
 0x28c   : > { %891 = vxpose.xlu0.b32.start.end [1/1] (short) (narrow) (!%p1628_p5), %v1943_v1, 8 }
 0x2e0   : > { %v712_v37 = vpop.permute.xlu0 %711 }
 0x2e1   : > { %v715_v38 = vsel %vm714_vm0, %v709_v36, %v712_v37 }
 0x2e2   : > { %1682 = vmatmul.mubr.msk.f32.vlgmr.msra.gmra.mrb[0].mxu0 %vm728_vm1, %v715_v38 }
 0x2e3   : > { %1693 = vmatprep.mubr.msk.f32.mxu0 (!%p1628_p5), %vm1873_vm3, %v1872_v52 }
 0x30c   : > { %v907_v53 = vpop.trf.xlu0 (!%p1628_p5) }
 0x3b5   : > { %v800_v43 = vpop.f32.mrb[0].mxu0 }
 0x3b6   : > { %v801_v44 = vadd.f32 %v1623_v42, %v800_v43  ;;  %v1683_v45 = vpop.f32.mrb[1].mxu0 }
 0x3b8   : > { %v804_v46 = vmax.f32 %v801_v44, 0.0 }
 0x3ba   : > { %1689 = vmatmul.mubr.msk.f32.vlgmr.msra.gmra.mrb[0].mxu1 %vm812_vm2, %v804_v46 }
 0x48a   : > { %889 = sbr.rel (%p1628_p5) target bundleno = 1386 (0x56a), region = 52 }
 0x48d   : > { %v882_v48 = vpop.f32.mrb[0].mxu1 }
 0x48e   : > { %v883_v49 = vadd.f32 %v1626_v47, %v882_v48  ;;  %v1690_v50 = vpop.f32.mrb[1].mxu1 }
 0x490   : > { %v886_v51 = vmax.f32 %v883_v49, 0.0 }
 0x492   : > { %1692 = vmatpush3.msra.mxu0 %v886_v51 }
 0x493   : > { %1694 = vmatmul.mubr.msk.f32.vlgmr.msra.gmra.mrb[0].mxu0 %vm923_vm4, %v907_v53 }
 0x566   : > { %v993_v55 = vpop.f32.mrb[0].mxu0 }
 0x567   : > { %v997_v56 = vadd.f32 %v993_v55, %v890_v54  ;;  %v1695_v57 = vpop.f32.mrb[1].mxu0 }
 0x569   : > { %998 = vst.msk [vmem:[#allocation3] sm:$0xff] %vm812_vm2, %v997_v56 }
 0x56a PF: > { %p1630_p6 = scmp.ne.s32.totalorder %s1854_s21, 1 }
 0x56b   : > { %vm1005_vm5 = vcmask (!%p1630_p6), 64512   ;;  %v1874_v58 = vmov (!%p1630_p6), 0.0   ;;  %vm1875_vm6 = vmmov (!%p1630_p6), 0   ;;  %v1083_v59 = vld [vmem:[%s2154_s5 + $0x28] sm:$0xff] (!%p1630_p6)  ;;  %v1084_v60 = vld [vmem:[%s2154_s5 + $0x30] sm:$0xff] (!%p1630_p6)  ;;  %v1085_v62 = vld [vmem:[%s2154_s5 + $0x38] sm:$0xff] (!%p1630_p6) }
 0x56c   : > { %1003 = sbr.rel (%p1630_p6) target bundleno = 2936 (0xb78), region = 56  ;;  %1696 = vmatprep.subr.mxu0 (!%p1630_p6), %v1874_v58  ;;  %1698 = vmatprep.mubr.msk.f32.mxu0 (!%p1630_p6), %vm1875_vm6, %v1874_v58  ;;  %v1876_v63 = vmov (!%p1630_p6), 0.0|0.0   ;;  %v1756_v2 = vpack.c.bf16 (!%p1630_p6), %v1084_v60, %v1083_v59  ;;  %v1167_v4 = vld [vmem:[%s2154_s5 + $0x50] sm:$0xff] (!%p1630_p6)  ;;  %v1168_v5 = vld [vmem:[%s2154_s5 + $0x58] sm:$0xff] (!%p1630_p6)  ;;  %s1877_s27 = smov (!%p1630_p6), 16   ;;  %vm1092_vm7 = vcmask (!%p1630_p6), 261120  }
 0x56d   : > { %1709 = vmatprep.mubr.msk.f32.mxu1 (!%p1630_p6), %vm1875_vm6, %v1874_v58  ;;  %1755 = vmatprep.subr.bf16.mxu1 (!%p1630_p6), %v1876_v63  ;;  %v1762_v6 = vpack.c.bf16 (!%p1630_p6), %v1168_v5, %v1167_v4  ;;  %v1169_v11 = vld [vmem:[%s2154_s5 + $0x60] sm:$0xff] (!%p1630_p6)  ;;  %v1170_v61 = vld [vmem:[%s2154_s5 + $0x68] sm:$0xff] (!%p1630_p6)  ;;  %v1250_v13 = vld [vmem:[%s2154_s5 + $0x78] sm:$0xff] (!%p1630_p6)  ;;  %s1878_s25 = smov (!%p1630_p6), 6   ;;  %s1879_s30 = smov (!%p1630_p6), 112   ;;  %vm1508_vm8 = vcmask (!%p1630_p6), 179200  }
 0x56e   : > { %1757 = vmatpush3.bf16.msra.mxu1 (!%p1630_p6), %v1756_v2  ;;  %v1765_v12 = vpack.c.bf16 (!%p1630_p6), %v1170_v61, %v1169_v11  ;;  %v1251_v14 = vld [vmem:[%s2154_s5 + $0x80] sm:$0xff] (!%p1630_p6)  ;;  %v1632_v16 = vld [vmem:[%s2154_s5 + $0x48] ss:$0 sm:$0xff] (!%p1630_p6)  ;;  %v1253_v22 = vld [vmem:[%s2154_s5 + $0x90] sm:$0xff] (!%p1630_p6)  ;;  %vm1510_vm9 = vcmask (!%p1630_p6), 310272  }
 0x56f   : > { %1758 = vmatprep.subr.bf16.mxu1 (!%p1630_p6), %v1876_v63  ;;  %v1768_v15 = vpack.c.bf16 (!%p1630_p6), %v1251_v14, %v1250_v13  ;;  %v1252_v21 = vld [vmem:[%s2154_s5 + $0x88] sm:$0xff] (!%p1630_p6)  ;;  %v1634_v24 = vld [vmem:[%s2154_s5 + $0x70] ss:$0 sm:$0xff] (!%p1630_p6)  ;;  %v1636_v29 = vld [vmem:[%s2154_s5 + $0x98] ss:$0 sm:$0xff] (!%p1630_p6) }
 0x570   : > { %v1004_v1 = vld [vmem:[#allocation3] sm:$0xff] (!%p1630_p6)  ;;  %v1771_v23 = vpack.c.bf16 (!%p1630_p6), %v1253_v22, %v1252_v21  ;;  %v1342_v34 = vld [vmem:[%s2154_s5 + $0xa0] sm:$0xff] (!%p1630_p6)  ;;  %v1423_v43 = vld [vmem:[%s2154_s5 + $0xb8] sm:$0xff] (!%p1630_p6) }
 0x571   : > { %1697 = vmatpush3.msra.mxu0 (!%p1630_p6), %v1004_v1  ;;  %v1343_v35 = vld [vmem:[%s2154_s5 + $0xa8] sm:$0xff] (!%p1630_p6)  ;;  %v1332_v39 = vld [vmem:[%s2151_s2] sm:$0xff] (!%p1630_p6)  ;;  %v1638_v46 = vld [vmem:[%s2154_s5 + $0xb0] ss:$0 sm:$0xff] (!%p1630_p6) }
 0x572   : > { %1699 = vmatmul.mubr.msk.f32.vlgmr.msra.gmra.mrb[0].mxu0 (!%p1630_p6), %vm1005_vm5, %v1938_v0  ;;  %v1086_v0 = vld [vmem:[%s2154_s5 + $0x40] sm:$0xff] (!%p1630_p6)  ;;  %1761 = vmatprep.subr.bf16.mxu0 (!%p1630_p6), %v1876_v63  ;;  %v1774_v36 = vpack.c.bf16 (!%p1630_p6), %v1343_v35, %v1342_v34 }
 0x573   : > { %1720 = vmatprep.mubr.msk.f32.mxu0 %vm1875_vm6, %v1874_v58  ;;  %v1759_v3 = vpack.c.bf16 %v1086_v0, %v1085_v62  ;;  %1763 = vmatpush3.bf16.msra.mxu0 %v1762_v6  ;;  %v1424_v44 = vld [vmem:[%s2154_s5 + $0xc0] sm:$0xff] }
 0x574   : > { %1764 = vmatprep.subr.bf16.mxu0 %v1876_v63  ;;  %v1777_v45 = vpack.c.bf16 %v1424_v44, %v1423_v43 }
 0x575   : > { %1760 = vmatpush3.bf16.msra.mxu1 %v1759_v3 }
 0x576   : > { %1767 = vmatprep.subr.bf16.mxu1 %v1876_v63 }
 0x577   : > { %1766 = vmatpush3.bf16.msra.mxu0 %v1765_v12 }
 0x578   : > { %1773 = vmatprep.subr.bf16.mxu0 %v1876_v63 }
 0x645   : > { %v1074_v7 = vpop.f32.mrb[0].mxu0 }
 0x646   : > { %1079 = vrot.lane.b32.xlu0 %v1074_v7, %s1877_s27  ;;  %v1700_v8 = vpop.f32.mrb[1].mxu0 }
 0x6b8   : > { %v1080_v9 = vpop.permute.xlu0 %1079 }
 0x6b9   : > { %v1082_v10 = vsel %vm812_vm2, %v886_v51, %v1080_v9  ;;  %v1640_v51 = vld [vmem:[%s2154_s5 + $0xc8] ss:$0 sm:$0xff] }
 0x6ba   : > { %1710 = vmatmul.mubr.msk.f32.vlgmr.msra.gmra.mrb[0].mxu1 %vm1092_vm7, %v1082_v10 }
 0x6bb   : > { %1731 = vmatprep.mubr.msk.f32.mxu1 %vm1875_vm6, %v1874_v58  ;;  %1769 = vmatpush3.bf16.msra.mxu1 %v1768_v15 }
 0x6bc   : > { %1770 = vmatprep.subr.bf16.mxu1 %v1876_v63 }
 0x6bf   : > { %1772 = vmatpush3.bf16.msra.mxu1 %v1771_v23 }
 0x78d   : > { %v1162_v17 = vpop.f32.mrb[0].mxu1 }
 0x78e   : > { %v1163_v18 = vadd.f32 %v1632_v16, %v1162_v17  ;;  %v1711_v19 = vpop.f32.mrb[1].mxu1 }
 0x790   : > { %v1166_v20 = vmax.f32 %v1163_v18, 0.0 }
 0x792   : > { %1721 = vmatmul.mubr.msk.f32.vlgmr.msra.gmra.mrb[2].mxu0 %vm1092_vm7, %v1166_v20 }
 0x793   : > { %1738 = vmatprep.mubr.msk.f32.mxu0 %vm1875_vm6, %v1874_v58  ;;  %1775 = vmatpush3.bf16.msra.mxu0 %v1774_v36 }
 0x794   : > { %1776 = vmatprep.subr.bf16.mxu0 %v1876_v63 }
 0x865   : > { %v1245_v25 = vpop.f32.mrb[2].mxu0 }
 0x866   : > { %v1246_v26 = vadd.f32 %v1634_v24, %v1245_v25  ;;  %v1722_v27 = vpop.f32.mrb[3].mxu0 }
 0x868   : > { %v1249_v28 = vmax.f32 %v1246_v26, 0.0 }
 0x86a   : > { %1732 = vmatmul.mubr.msk.f32.vlgmr.msra.gmra.mrb[2].mxu1 %vm1092_vm7, %v1249_v28 }
 0x93d   : > { %v1328_v30 = vpop.f32.mrb[2].mxu1 }
 0x93e   : > { %v1329_v31 = vadd.f32 %v1636_v29, %v1328_v30  ;;  %v1733_v32 = vpop.f32.mrb[3].mxu1 }
 0x940   : > { %v1333_v33 = vmul.f32 0.5, %v1329_v31  ;;  %1504 = vrot.lane.b32.xlu1 %v1329_v31, %s1878_s25 }
 0x942   : > { %v1334_v37 = vmul.f32 1.442695, %v1333_v33 }
 0x944   : > { %1838 = vpow2.f32 %v1334_v37 }
 0x94e   : > { %v1839_v38 = vpop.eup %1838 }
 0x94f   : > { %1337 = vrot.lane.b32.xlu0 %v1839_v38, %s1879_s30 }
 0x9b2   : > { %v1505_v55 = vpop.permute.xlu1 %1504 }
 0x9c1   : > { %v1338_v40 = vpop.permute.xlu0 %1337 }
 0x9c2   : > { %v1340_v41 = vmul.f32 %v1338_v40, %v1332_v39 }
 0x9c4   : > { %v1341_v42 = vadd.f32 %v1340_v41, %v1329_v31 }
 0x9c6   : > { %1739 = vmatmul.mubr.msk.f32.vlgmr.msra.gmra.mrb[4].mxu0 %vm812_vm2, %v1341_v42 }
 0x9c7   : > { %1745 = vmatprep.mubr.msk.f32.mxu0 %vm1875_vm6, %v1874_v58  ;;  %1778 = vmatpush3.bf16.msra.mxu0 %v1777_v45 }
 0xa99   : > { %v1418_v47 = vpop.f32.mrb[4].mxu0 }
 0xa9a   : > { %v1419_v48 = vadd.f32 %v1638_v46, %v1418_v47  ;;  %v1740_v49 = vpop.f32.mrb[5].mxu0 }
 0xa9c   : > { %v1422_v50 = vmax.f32 %v1419_v48, 0.0 }
 0xa9e   : > { %1746 = vmatmul.mubr.msk.f32.vlgmr.msra.gmra.mrb[6].mxu0 %vm812_vm2, %v1422_v50 }
 0xb71   : > { %v1499_v52 = vpop.f32.mrb[6].mxu0 }
 0xb72   : > { %v1500_v53 = vadd.f32 %v1640_v51, %v1499_v52  ;;  %v1747_v54 = vpop.f32.mrb[7].mxu0 }
 0xb74   : > { %v1507_v56 = vsel %vm714_vm0, %v1500_v53, %v1505_v55 }
 0xb75   : > { %v1509_v57 = vsel %vm1508_vm8, %v1507_v56, %v1505_v55 }
 0xb76   : > { %v1511_v1 = vsel %vm1510_vm9, %v1509_v57, 0.0 }
 0xb77   : > { %1512 = vst [vmem:[%s2155_s6] sm:$0xff] %v1511_v1 }
 0xb78 PF: > { %s16_s23 = sadd.s32 1, %s1862_s23   ;;  %s2156_s21 = smov %s1858_s22 }
 0xb79   : > { %p13_p7 = scmp.ge.s32.totalorder %s16_s23, 4   ;;  %s2157_s22 = smov %s2159_s24 }
 0xb7b   :  { %15 = sbr.rel (!%p13_p7) target bundleno = 2 (0x2), region = 93 }

</bundles_post_ra>
